<compile_context>
chip_gen: v7x
topology: tpu7x:2x2x1
jax: 0.10.0
libtpu: 0.0.40
codegen_flags: <defaults>
</compile_context>

<pallas_src>
import jax
import jax.numpy as jnp
from jax.experimental import pallas as pl
from jax.experimental.pallas import tpu as pltpu


# ----------------------------- config (small, synthetic) -----------------------------
VOCAB_SIZE    = 50
V_PAD         = 64           # vocab padded to a bf16-sublane-exact row count
EMBEDDING_DIM = 32
NUM_FILTERS   = 16
F_PAD         = 128          # lane-dense padded filter count (one 128-wide MXU pass)
KERNEL_SIZE   = 3
N_CLASS       = 2
C_PAD         = 128          # lane-dense padded class count for the output store
HIDDEN        = 512
SEQ_LEN       = 16
BATCH         = 2


# --------------------------------- forward (Pallas) ---------------------------------
def textcnn_forward(tokens, kp):
    """tokens: (B, L) int; kp: prepped params from prep_kernel_params()."""
    B, L = tokens.shape
    k, Vp, Fp = kp["w_fold"].shape
    Cp = kp["w_fused"].shape[1]
    T = L - k + 1                      # valid-conv output length per sequence
    R = B * L                          # flattened token-stream length
    Npad = ((R + k - 1 + 7) // 8) * 8  # pad so shifted slices never read OOB

    # Clip OOB token ids (torch nn.Embedding would raise); flatten + pad with id 0.
    tok = jnp.clip(tokens.astype(jnp.int32), 0, VOCAB_SIZE - 1)
    tok_flat = jnp.zeros((Npad, 1), jnp.int32).at[:R, 0].set(tok.reshape(R))

    def kernel(tok_ref, wfold_ref, wf_ref, bias_ref, out_ref):
        """Whole batch in one step.

        tok_ref   : (Npad, 1)   int32  flattened (batch-major) token ids
        wfold_ref : (k, Vp, Fp) bf16   embedding folded into conv weights
        wf_ref    : (Fp, Cp)    f32    fused FC weight (fc2_w @ fc_w, padded)
        bias_ref  : (2, Cp)     f32    row 0 = conv bias, row 1 = fused FC bias
        out_ref   : (B, Cp)     f32    padded logits (first N_CLASS lanes valid)
        """
        tok_all = tok_ref[...]                                   # (Npad, 1) int32
        bias = bias_ref[...]                                     # (2, Cp)   f32
        iota_v = jax.lax.broadcasted_iota(jnp.int32, (R, Vp), 1)  # (R, Vp)

        # Conv as k shifted one-hot matmuls against the folded (embedding x conv)
        # weights; f32 accumulation, bf16 only as MXU operands.
        acc = jnp.zeros((R, Fp), jnp.float32)
        for j in range(k):                                       # k is static & tiny
            onehot_j = jnp.where(iota_v == tok_all[j:j + R, :],
                                 1.0, 0.0).astype(jnp.bfloat16)  # (R, Vp)
            acc = acc + jnp.dot(onehot_j, wfold_ref[j],
                                preferred_element_type=jnp.float32)  # (R, Fp)

        conv = jnp.maximum(acc + bias[0:1, :], 0.0)              # ReLU (R, Fp)

        # Mask rows whose k-window crosses a sequence boundary. Exact because
        # ReLU output is >= 0, so a 0 never changes the per-sequence max.
        pos = jax.lax.broadcasted_iota(jnp.int32, (R, Fp), 0) % L
        conv = jnp.where(pos < T, conv, 0.0)

        # Global max-pool per sequence (static unroll over the small batch).
        pooled = jnp.concatenate(
            [jnp.max(conv[b * L:(b + 1) * L, :], axis=0, keepdims=True)
             for b in range(B)],
            axis=0)                                              # (B, Fp)

        # Fused FC2 + fc (dropout = identity in eval mode). Lane-dense store.
        logits = jnp.dot(pooled, wf_ref[...],
                         preferred_element_type=jnp.float32) + bias[1:2, :]  # (B, Cp)
        out_ref[...] = logits.astype(out_ref.dtype)

    out = pl.pallas_call(
        kernel,
        out_shape=jax.ShapeDtypeStruct((B, Cp), jnp.float32),
        grid=(1,),                                               # whole batch, one step
        in_specs=[
            pl.BlockSpec((Npad, 1),   lambda i: (0, 0)),         # tokens
            pl.BlockSpec((k, Vp, Fp), lambda i: (0, 0, 0)),      # folded conv weights
            pl.BlockSpec((Fp, Cp),    lambda i: (0, 0)),         # fused FC weight
            pl.BlockSpec((2, Cp),     lambda i: (0, 0)),         # bias slab
        ],
        out_specs=pl.BlockSpec((B, Cp), lambda i: (0, 0)),
        compiler_params=pltpu.CompilerParams(
            dimension_semantics=("arbitrary",)),
    )(tok_flat, kp["w_fold"], kp["w_fused"], kp["biases"])

    return out[:, :N_CLASS]


# --------------------------- parameters / weight prep ---------------------------
def init_params(key):
    """Deterministic synthetic parameters matching the torch module's shapes."""
    ks = jax.random.split(key, 7)
    embedding = jax.random.normal(ks[0], (VOCAB_SIZE, EMBEDDING_DIM), jnp.float32) * 0.1
    # nn.Conv2d(1, F, (k, E)) weight is (F, 1, k, E) in torch
    conv_w = jax.random.normal(ks[1], (NUM_FILTERS, 1, KERNEL_SIZE, EMBEDDING_DIM),
                               jnp.float32) * 0.1
    conv_b = jax.random.normal(ks[2], (1, NUM_FILTERS), jnp.float32) * 0.1
    # nn.Linear(F, 512) / nn.Linear(512, n_class), stored in math layout (in, out)
    fc2_w = jax.random.normal(ks[3], (NUM_FILTERS, HIDDEN), jnp.float32) * 0.1
    fc2_b = jax.random.normal(ks[4], (1, HIDDEN), jnp.float32) * 0.1
    fc_w = jax.random.normal(ks[5], (HIDDEN, N_CLASS), jnp.float32) * 0.1
    fc_b = jax.random.normal(ks[6], (1, N_CLASS), jnp.float32) * 0.1
    return dict(embedding=embedding, conv_w=conv_w, conv_b=conv_b,
                fc2_w=fc2_w, fc2_b=fc2_b, fc_w=fc_w, fc_b=fc_b)


def prep_kernel_params(p):
    """One-time weight prep: fold embedding into conv weights, fold fc2@fc,
    zero-pad to lane/sublane-exact shapes, cast MXU weights to bf16."""
    hi = jax.lax.Precision.HIGHEST

    # Fold embedding table into the conv weights: W_fold[j] = table @ conv_w[j].
    cw = jnp.transpose(p["conv_w"][:, 0, :, :], (1, 2, 0))            # (k, E, F)
    w_fold = jnp.einsum("ve,kef->kvf", p["embedding"], cw, precision=hi)   # (k, V, F)
    w_fold_pad = (jnp.zeros((KERNEL_SIZE, V_PAD, F_PAD), jnp.float32)
                  .at[:, :VOCAB_SIZE, :NUM_FILTERS].set(w_fold)
                  ).astype(jnp.bfloat16)                               # (k, Vp, Fp) bf16

    # Fold FC2 and fc (valid only because there is no nonlinearity between them
    # and dropout is eval-mode identity).
    w_fused = jnp.matmul(p["fc2_w"], p["fc_w"], precision=hi)          # (F, C)
    w_fused_pad = (jnp.zeros((F_PAD, C_PAD), jnp.float32)
                   .at[:NUM_FILTERS, :N_CLASS].set(w_fused))           # (Fp, Cp) f32
    b_fused = jnp.matmul(p["fc2_b"], p["fc_w"], precision=hi) + p["fc_b"]  # (1, C)

    # Single bias slab: row 0 = conv bias (over Fp lanes), row 1 = fused FC bias.
    biases = (jnp.zeros((2, C_PAD), jnp.float32)
              .at[0, :NUM_FILTERS].set(p["conv_b"][0])
              .at[1, :N_CLASS].set(b_fused[0]))                        # (2, 128) f32

    return dict(w_fold=w_fold_pad, w_fused=w_fused_pad, biases=biases)


# ------------------------------- pure-JAX reference -------------------------------
def reference_forward(tokens, p):
    """Torch-faithful f32 forward (gather -> conv -> relu -> max-pool -> FC2 -> fc),
    using the ORIGINAL f32 weights (no folding, no bf16), eval-mode dropout."""
    hi = jax.lax.Precision.HIGHEST
    tok = jnp.clip(tokens.astype(jnp.int32), 0, VOCAB_SIZE - 1)
    emb = jnp.take(p["embedding"], tok, axis=0)                        # (B, L, E)
    cw = jnp.transpose(p["conv_w"][:, 0, :, :], (1, 2, 0))             # (k, E, F)
    B, L, _ = emb.shape
    k = cw.shape[0]
    T = L - k + 1
    acc = jnp.zeros((B, T, cw.shape[2]), jnp.float32)
    for j in range(k):
        acc = acc + jnp.einsum("ble,ef->blf", emb[:, j:j + T, :], cw[j], precision=hi)
    conv = jax.nn.relu(acc + p["conv_b"])                              # (B, T, F)
    pooled = jnp.max(conv, axis=1)                                     # (B, F)
    hidden = jnp.matmul(pooled, p["fc2_w"], precision=hi) + p["fc2_b"]
    return jnp.matmul(hidden, p["fc_w"], precision=hi) + p["fc_b"]


if __name__ == "__main__":
    key = jax.random.PRNGKey(0)
    pkey, tkey = jax.random.split(key)
    params = init_params(pkey)
    kernel_params = prep_kernel_params(params)
    tokens = jax.random.randint(tkey, (BATCH, SEQ_LEN), 0, VOCAB_SIZE, dtype=jnp.int32)

    out = textcnn_forward(tokens, kernel_params)
    out = jax.block_until_ready(out)

    # Compare against the un-folded, full-f32 torch-faithful reference; the only
    # deviation is the bf16 rounding of the folded conv weights (<~2e-3 on logits).
    ref = reference_forward(tokens, params)

    assert out.shape == (BATCH, N_CLASS), out.shape
    assert jnp.allclose(out, ref, atol=1e-2, rtol=1e-2), (out, ref)

    print("KERNEL_OK")
</pallas_src>

<mosaic_0001>
module attributes {stable_mosaic.version = 11 : i64} {
  func.func @kernel(%arg0: i32, %arg1: memref<40x1xi32, #tpu.memory_space<vmem>>, %arg2: memref<3x64x128xbf16, #tpu.memory_space<vmem>>, %arg3: memref<128x128xf32, #tpu.memory_space<vmem>>, %arg4: memref<2x128xf32, #tpu.memory_space<vmem>>, %arg5: memref<2x128xf32, #tpu.memory_space<vmem>>) attributes {dimension_semantics = [#tpu.dimension_semantics<arbitrary>], iteration_bounds = array<i64: 1>, scalar_prefetch = 0 : i64, scratch_operands = 0 : i64, tpu.core_type = #tpu.core_type<tc>, window_params = [{pipeline_mode = #tpu.pipeline_mode<synchronous>, transform_indices = @transform_0, window_bounds = array<i64: 40, 1>}, {pipeline_mode = #tpu.pipeline_mode<synchronous>, transform_indices = @transform_1, window_bounds = array<i64: 3, 64, 128>}, {pipeline_mode = #tpu.pipeline_mode<synchronous>, transform_indices = @transform_2, window_bounds = array<i64: 128, 128>}, {pipeline_mode = #tpu.pipeline_mode<synchronous>, transform_indices = @transform_3, window_bounds = array<i64: 2, 128>}, {pipeline_mode = #tpu.pipeline_mode<synchronous>, transform_indices = @transform_4, window_bounds = array<i64: 2, 128>}]} {
    %c0 = arith.constant 0 : index
    %c0_0 = arith.constant 0 : index
    %0 = vector.load %arg1[%c0, %c0_0] : memref<40x1xi32, #tpu.memory_space<vmem>>, vector<40x1xi32>
    %c0_1 = arith.constant 0 : index
    %c0_2 = arith.constant 0 : index
    %1 = vector.load %arg4[%c0_1, %c0_2] : memref<2x128xf32, #tpu.memory_space<vmem>>, vector<2x128xf32>
    %2 = tpu.iota {dimensions = array<i32: 1>} : vector<32x64xi32>
    %cst = arith.constant 0.000000e+00 : f32
    %3 = vector.broadcast %cst : f32 to vector<32x128xf32>
    %4 = vector.extract_strided_slice %0 {offsets = [0, 0], sizes = [32, 1], strides = [1, 1]} : vector<40x1xi32> to vector<32x1xi32>
    %5 = vector.broadcast %4 : vector<32x1xi32> to vector<32x64xi32>
    %6 = arith.cmpi eq, %2, %5 : vector<32x64xi32>
    %cst_3 = arith.constant 1.000000e+00 : f32
    %cst_4 = arith.constant 0.000000e+00 : f32
    %7 = vector.broadcast %cst_3 : f32 to vector<32x64xf32>
    %8 = vector.broadcast %cst_4 : f32 to vector<32x64xf32>
    %9 = arith.select %6, %7, %8 : vector<32x64xi1>, vector<32x64xf32>
    %10 = arith.truncf %9 : vector<32x64xf32> to vector<32x64xbf16>
    %c0_5 = arith.constant 0 : index
    %c0_6 = arith.constant 0 : index
    %c0_7 = arith.constant 0 : index
    %11 = vector.load %arg2[%c0_5, %c0_6, %c0_7] : memref<3x64x128xbf16, #tpu.memory_space<vmem>>, vector<1x64x128xbf16>
    %12 = vector.shape_cast %11 : vector<1x64x128xbf16> to vector<64x128xbf16>
    %cst_8 = arith.constant dense<0.000000e+00> : vector<32x128xf32>
    %13 = tpu.matmul %10, %12, %cst_8 {dimension_numbers = #tpu.dot_dimension_numbers<[1], [0], [0], [1], [0, 0, 1, 1], [], []>} : vector<32x64xbf16>, vector<64x128xbf16>, vector<32x128xf32> -> vector<32x128xf32>
    %14 = arith.addf %3, %13 : vector<32x128xf32>
    %15 = vector.extract_strided_slice %0 {offsets = [1, 0], sizes = [32, 1], strides = [1, 1]} : vector<40x1xi32> to vector<32x1xi32>
    %16 = vector.broadcast %15 : vector<32x1xi32> to vector<32x64xi32>
    %17 = arith.cmpi eq, %2, %16 : vector<32x64xi32>
    %cst_9 = arith.constant 1.000000e+00 : f32
    %cst_10 = arith.constant 0.000000e+00 : f32
    %18 = vector.broadcast %cst_9 : f32 to vector<32x64xf32>
    %19 = vector.broadcast %cst_10 : f32 to vector<32x64xf32>
    %20 = arith.select %17, %18, %19 : vector<32x64xi1>, vector<32x64xf32>
    %21 = arith.truncf %20 : vector<32x64xf32> to vector<32x64xbf16>
    %c1 = arith.constant 1 : index
    %c0_11 = arith.constant 0 : index
    %c0_12 = arith.constant 0 : index
    %22 = vector.load %arg2[%c1, %c0_11, %c0_12] : memref<3x64x128xbf16, #tpu.memory_space<vmem>>, vector<1x64x128xbf16>
    %23 = vector.shape_cast %22 : vector<1x64x128xbf16> to vector<64x128xbf16>
    %cst_13 = arith.constant dense<0.000000e+00> : vector<32x128xf32>
    %24 = tpu.matmul %21, %23, %cst_13 {dimension_numbers = #tpu.dot_dimension_numbers<[1], [0], [0], [1], [0, 0, 1, 1], [], []>} : vector<32x64xbf16>, vector<64x128xbf16>, vector<32x128xf32> -> vector<32x128xf32>
    %25 = arith.addf %14, %24 : vector<32x128xf32>
    %26 = vector.extract_strided_slice %0 {offsets = [2, 0], sizes = [32, 1], strides = [1, 1]} : vector<40x1xi32> to vector<32x1xi32>
    %27 = vector.broadcast %26 : vector<32x1xi32> to vector<32x64xi32>
    %28 = arith.cmpi eq, %2, %27 : vector<32x64xi32>
    %cst_14 = arith.constant 1.000000e+00 : f32
    %cst_15 = arith.constant 0.000000e+00 : f32
    %29 = vector.broadcast %cst_14 : f32 to vector<32x64xf32>
    %30 = vector.broadcast %cst_15 : f32 to vector<32x64xf32>
    %31 = arith.select %28, %29, %30 : vector<32x64xi1>, vector<32x64xf32>
    %32 = arith.truncf %31 : vector<32x64xf32> to vector<32x64xbf16>
    %c2 = arith.constant 2 : index
    %c0_16 = arith.constant 0 : index
    %c0_17 = arith.constant 0 : index
    %33 = vector.load %arg2[%c2, %c0_16, %c0_17] : memref<3x64x128xbf16, #tpu.memory_space<vmem>>, vector<1x64x128xbf16>
    %34 = vector.shape_cast %33 : vector<1x64x128xbf16> to vector<64x128xbf16>
    %cst_18 = arith.constant dense<0.000000e+00> : vector<32x128xf32>
    %35 = tpu.matmul %32, %34, %cst_18 {dimension_numbers = #tpu.dot_dimension_numbers<[1], [0], [0], [1], [0, 0, 1, 1], [], []>} : vector<32x64xbf16>, vector<64x128xbf16>, vector<32x128xf32> -> vector<32x128xf32>
    %36 = arith.addf %25, %35 : vector<32x128xf32>
    %37 = vector.extract_strided_slice %1 {offsets = [0, 0], sizes = [1, 128], strides = [1, 1]} : vector<2x128xf32> to vector<1x128xf32>
    %38 = vector.broadcast %37 : vector<1x128xf32> to vector<32x128xf32>
    %39 = arith.addf %36, %38 : vector<32x128xf32>
    %cst_19 = arith.constant 0.000000e+00 : f32
    %40 = vector.broadcast %cst_19 : f32 to vector<32x128xf32>
    %41 = arith.maximumf %39, %40 : vector<32x128xf32>
    %42 = tpu.iota {dimensions = array<i32: 0>} : vector<32x128xi32>
    %c16_i32 = arith.constant 16 : i32
    %c0_i32 = arith.constant 0 : i32
    %43 = arith.cmpi eq, %c16_i32, %c0_i32 : i32
    %c1_i32 = arith.constant 1 : i32
    %44 = arith.select %43, %c1_i32, %c16_i32 : i32
    %45 = vector.broadcast %44 : i32 to vector<32x128xi32>
    %46 = arith.remsi %42, %45 : vector<32x128xi32>
    %c0_i32_20 = arith.constant 0 : i32
    %47 = vector.broadcast %c0_i32_20 : i32 to vector<32x128xi32>
    %48 = arith.cmpi ne, %46, %47 : vector<32x128xi32>
    %c0_i32_21 = arith.constant 0 : i32
    %49 = vector.broadcast %c0_i32_21 : i32 to vector<32x128xi32>
    %50 = arith.cmpi slt, %46, %49 : vector<32x128xi32>
    %c0_i32_22 = arith.constant 0 : i32
    %51 = arith.cmpi slt, %44, %c0_i32_22 : i32
    %52 = vector.broadcast %51 : i1 to vector<32x128xi1>
    %53 = vector.broadcast %52 : vector<32x128xi1> to vector<32x128xi1>
    %54 = arith.xori %50, %53 : vector<32x128xi1>
    %55 = arith.andi %54, %48 : vector<32x128xi1>
    %56 = vector.broadcast %44 : i32 to vector<32x128xi32>
    %57 = arith.addi %46, %56 : vector<32x128xi32>
    %58 = arith.select %55, %57, %46 : vector<32x128xi1>, vector<32x128xi32>
    %c14_i32 = arith.constant 14 : i32
    %59 = vector.broadcast %c14_i32 : i32 to vector<32x128xi32>
    %60 = arith.cmpi slt, %58, %59 : vector<32x128xi32>
    %cst_23 = arith.constant 0.000000e+00 : f32
    %61 = vector.broadcast %cst_23 : f32 to vector<32x128xf32>
    %62 = arith.select %60, %41, %61 : vector<32x128xi1>, vector<32x128xf32>
    %63 = vector.extract_strided_slice %62 {offsets = [0, 0], sizes = [16, 128], strides = [1, 1]} : vector<32x128xf32> to vector<16x128xf32>
    %cst_24 = arith.constant dense<0xFF800000> : vector<128xf32>
    %64 = vector.multi_reduction <maximumf>, %63, %cst_24 [0] : vector<16x128xf32> to vector<128xf32>
    %65 = vector.shape_cast %64 : vector<128xf32> to vector<1x128xf32>
    %66 = vector.extract_strided_slice %62 {offsets = [16, 0], sizes = [16, 128], strides = [1, 1]} : vector<32x128xf32> to vector<16x128xf32>
    %cst_25 = arith.constant dense<0xFF800000> : vector<128xf32>
    %67 = vector.multi_reduction <maximumf>, %66, %cst_25 [0] : vector<16x128xf32> to vector<128xf32>
    %68 = vector.shape_cast %67 : vector<128xf32> to vector<1x128xf32>
    %69 = tpu.concatenate %65, %68 in 0 : vector<1x128xf32>, vector<1x128xf32> -> vector<2x128xf32>
    %c0_26 = arith.constant 0 : index
    %c0_27 = arith.constant 0 : index
    %70 = vector.load %arg3[%c0_26, %c0_27] : memref<128x128xf32, #tpu.memory_space<vmem>>, vector<128x128xf32>
    %cst_28 = arith.constant dense<0.000000e+00> : vector<2x128xf32>
    %71 = tpu.matmul %69, %70, %cst_28 {dimension_numbers = #tpu.dot_dimension_numbers<[1], [0], [0], [1], [0, 0, 1, 1], [], []>} : vector<2x128xf32>, vector<128x128xf32>, vector<2x128xf32> -> vector<2x128xf32>
    %72 = vector.extract_strided_slice %1 {offsets = [1, 0], sizes = [1, 128], strides = [1, 1]} : vector<2x128xf32> to vector<1x128xf32>
    %73 = vector.broadcast %72 : vector<1x128xf32> to vector<2x128xf32>
    %74 = arith.addf %71, %73 : vector<2x128xf32>
    %c0_29 = arith.constant 0 : index
    %c0_30 = arith.constant 0 : index
    %75 = vector.load %arg5[%c0_29, %c0_30] : memref<2x128xf32, #tpu.memory_space<vmem>>, vector<2x128xf32>
    tpu.vector_store %arg5[%c0_29, %c0_30], %74 {strides = array<i32>} : memref<2x128xf32, #tpu.memory_space<vmem>>, vector<2x128xf32>,
    return
  }
  func.func @transform_0(%arg0: i32) -> (i32, i32) {
    %c0_i32 = arith.constant 0 : i32
    %c0_i32_0 = arith.constant 0 : i32
    %c0_i32_1 = arith.constant 0 : i32
    return %c0_i32, %c0_i32_0 : i32, i32
  }
  func.func @transform_1(%arg0: i32) -> (i32, i32, i32) {
    %c0_i32 = arith.constant 0 : i32
    %c0_i32_0 = arith.constant 0 : i32
    %c0_i32_1 = arith.constant 0 : i32
    %c0_i32_2 = arith.constant 0 : i32
    return %c0_i32, %c0_i32_0, %c0_i32_1 : i32, i32, i32
  }
  func.func @transform_2(%arg0: i32) -> (i32, i32) {
    %c0_i32 = arith.constant 0 : i32
    %c0_i32_0 = arith.constant 0 : i32
    %c0_i32_1 = arith.constant 0 : i32
    return %c0_i32, %c0_i32_0 : i32, i32
  }
  func.func @transform_3(%arg0: i32) -> (i32, i32) {
    %c0_i32 = arith.constant 0 : i32
    %c0_i32_0 = arith.constant 0 : i32
    %c0_i32_1 = arith.constant 0 : i32
    return %c0_i32, %c0_i32_0 : i32, i32
  }
  func.func @transform_4(%arg0: i32) -> (i32, i32) {
    %c0_i32 = arith.constant 0 : i32
    %c0_i32_0 = arith.constant 0 : i32
    %c0_i32_1 = arith.constant 0 : i32
    return %c0_i32, %c0_i32_0 : i32, i32
  }
}

</mosaic_0001>

<bundles_post_ra>
// kernel: tpu_custom_call.1
= control target key start
LH: loop header
LB: loop body
LE: loop exit
PB: predicated region body
PF: predicated region fallthrough
CT: control target
= control target key end

     0   :  { %9 = vsyncpa [#allocation3], 0  ;;  %s934_s0 = inlined_call_operand.vmem [shape: s32[40,1], index: 0, kind: input, shape index: {}]   ;;  %s935_s1 = inlined_call_operand.hbm [shape: bf16[3,64,128], index: 1, kind: input, shape index: {}]   ;;  %s936_s2 = inlined_call_operand.hbm [shape: f32[128,128], index: 2, kind: input, shape index: {}]   ;;  %s937_s3 = inlined_call_operand.vmem [shape: f32[2,128], index: 3, kind: input, shape index: {}]   ;;  %s938_s4 = inlined_call_operand.hbm [shape: f32[2,128], index: 4, kind: output, shape index: {}]  }
   0x1   :  { %10 = vsyncpa [#allocation6], 0 }
   0x2   :  { %11 = vsyncpa [#allocation4], 0  ;;  %s828_s15 = smov [#allocation2]   ;;  %s756_s19 = scalar_lea.hbm %s935_s1, 1536 }
   0x3   :  { %s19_s16 = sshll.u32 %s828_s15, 4  ;;  %p757_p0 = scmp.ne.s32.totalorder %s935_s1, %s756_s19  ;;  %s20_s16 = int_to_ptr.vmem [resolvable:$true] %s19_s16 }
   0x4   :  { %p760_p1 = scmp.lt.u32.totalorder %s756_s19, %s935_s1 }
   0x6   :  { %p762_p2 = pnand %p760_p1, %p757_p0 }
   0x8   :  { %765 = shalt.err (!%p762_p2)
}
   0x9   :  { %s766_s24 = scalar_lea.vmem %s20_s16, 1536  ;;  %p771_p4 = scmp.lt.s32.totalorder %s20_s16, %s20_s16 }
   0xa   :  { %p767_p3 = scmp.ne.s32.totalorder %s20_s16, %s766_s24  ;;  %p772_p5 = scmp.lt.s32.totalorder %s766_s24, %s766_s24 }
   0xc   :  { %p773_p6 = por %p772_p5, %p771_p4 }
   0xe   :  { %p774_p7 = pnand %p773_p6, %p767_p3 }
  0x10   :  { %777 = shalt.err (!%p774_p7)
}
  0x11   :  { %s829_s25 = smov 64   ;;  %s830_s26 = smov 4  }
  0x12   :  { %25 = dma.hbm_to_vmem [thread:$0]  %s935_s1, 1536, %s20_s16, [#allocation3], %s829_s25, %s829_s25, %s830_s26  }
  0x13   :  { %s831_s29 = smov [#allocation5]   ;;  %s778_s7 = scalar_lea.hbm %s936_s2, 2048 }
  0x14   :  { %s31_s30 = sshll.u32 %s831_s29, 4  ;;  %p779_p8 = scmp.ne.s32.totalorder %s936_s2, %s778_s7  ;;  %s32_s30 = int_to_ptr.vmem [resolvable:$true] %s31_s30 }
  0x15   :  { %p782_p9 = scmp.lt.u32.totalorder %s778_s7, %s936_s2 }
  0x17   :  { %p784_p10 = pnand %p782_p9, %p779_p8 }
  0x19   :  { %787 = shalt.err (!%p784_p10)
}
  0x1a   :  { %s788_s12 = scalar_lea.vmem %s32_s30, 2048  ;;  %p793_p12 = scmp.lt.s32.totalorder %s32_s30, %s32_s30 }
  0x1b   :  { %p789_p11 = scmp.ne.s32.totalorder %s32_s30, %s788_s12  ;;  %p794_p13 = scmp.lt.s32.totalorder %s788_s12, %s788_s12 }
  0x1d   :  { %p795_p0 = por %p794_p13, %p793_p12 }
  0x1f   :  { %p796_p1 = pnand %p795_p0, %p789_p11 }
  0x21   :  { %799 = shalt.err (!%p796_p1)
}
  0x22   :  { %s832_s1 = smov 128   ;;  %s833_s13 = smov 8  }
  0x23   :  { %37 = dma.hbm_to_vmem [thread:$0]  %s936_s2, 2048, %s32_s30, [#allocation6], %s832_s1, %s832_s1, %s833_s13  }
  0x24   :  { %822 = dma.done.wait [#allocation3], 1536  }
  0x25   :  { %823 = vsyncadd [#allocation3], 4294965760 }
  0x26   :  { %824 = dma.done.wait [#allocation6], 2048  }
  0x27   :  { %825 = vsyncadd [#allocation6], 4294965248  ;;  %v834_v0 = vmov 0   ;;  %v49_v1 = vld [vmem:[%s934_s0 + $0x10] sm:$0xff]  ;;  %v47_v2 = vld [vmem:[%s934_s0] sm:$0xff]  ;;  %v53_v15 = vlaneseq  ;;  %vm145_vm4 = vcmask 523264  }
  0x28   :  { %743 = vset.pattern.permute.xlu1 %v834_v0  ;;  %742 = vset.pattern.permute.xlu0 %v834_v0  ;;  %v50_v3 = vld [vmem:[%s934_s0 + $0x18] sm:$0xff]  ;;  %v48_v4 = vld [vmem:[%s934_s0 + $0x8] sm:$0xff]  ;;  %v744_v5 = vld [vmem:[#allocation2] sm:$0xff]   ;;  %v835_v21 = vmov 0.0   ;;  %vm290_vm5 = vcmask 1046528   ;;  %v836_v54 = vmov 0.0|0.0  }
  0x29   :  { %62 = vperm.xlu1 %743, %v49_v1   ;;  %56 = vperm.xlu0 %742, %v47_v2   ;;  %v745_v6 = vld [vmem:[#allocation2 + $0x8] sm:$0xff]   ;;  %v51_v7 = vld [vmem:[%s934_s0 + $0x20] sm:$0xff]  ;;  %v747_v8 = vld [vmem:[#allocation2 + $0x20] sm:$0xff]   ;;  %v54_v16 = vand.u32 127, %v53_v15  ;;  %vm100_vm7 = vsmask.f32 7424 }
  0x2a   :  { %640 = vmatprep.subr.bf16.mxu0 %v744_v5  ;;  %v746_v9 = vld [vmem:[#allocation2 + $0x10] sm:$0xff]   ;;  %628 = vmatprep.subr.bf16.mxu1 %v747_v8  ;;  %v749_v10 = vld [vmem:[#allocation2 + $0x28] sm:$0xff]   ;;  %v748_v12 = vld [vmem:[#allocation2 + $0x18] sm:$0xff]   ;;  %vm837_vm8 = vmmov 0   ;;  %vm466_vm11 = vcmask 1040384  }
  0x2b   :  { %641 = vmatpush3.bf16.msra.mxu0 %v744_v5  ;;  %629 = vmatpush3.bf16.msra.mxu1 %v747_v8  ;;  %v751_v11 = vld [vmem:[#allocation2 + $0x30] sm:$0xff]   ;;  %v753_v13 = vld [vmem:[#allocation2 + $0x38] sm:$0xff]   ;;  %v750_v14 = vld [vmem:[#allocation2 + $0x40] sm:$0xff]  }
  0x2c   :  { %642 = vmatprep.subr.bf16.mxu0 %v745_v6  ;;  %630 = vmatprep.subr.bf16.mxu1 %v749_v10  ;;  %v752_v29 = vld [vmem:[#allocation2 + $0x48] sm:$0xff]   ;;  %v754_v40 = vld [vmem:[#allocation2 + $0x50] sm:$0xff]   ;;  %v755_v47 = vld [vmem:[#allocation2 + $0x58] sm:$0xff]  }
  0x2d   :  { %65 = vperm.xlu1 %743, %v50_v3   ;;  %59 = vperm.xlu0 %742, %v48_v4   ;;  %v468_v51 = vld [vmem:[#allocation5] sm:$0xff]  ;;  %v469_v52 = vld [vmem:[#allocation5 + $0x8] sm:$0xff]  ;;  %v470_v55 = vld [vmem:[#allocation5 + $0x10] sm:$0xff] }
  0x2e   :  { %v700_v53 = vpack.c.bf16 %v469_v52, %v468_v51  ;;  %v471_v56 = vld [vmem:[#allocation5 + $0x18] sm:$0xff]  ;;  %v472_v58 = vld [vmem:[#allocation5 + $0x20] sm:$0xff]  ;;  %v473_v59 = vld [vmem:[#allocation5 + $0x28] sm:$0xff] }
  0x2f   :  { %643 = vmatpush3.bf16.msra.mxu0 %v745_v6  ;;  %631 = vmatpush3.bf16.msra.mxu1 %v749_v10  ;;  %v703_v57 = vpack.c.bf16 %v471_v56, %v470_v55  ;;  %v706_v60 = vpack.c.bf16 %v473_v59, %v472_v58  ;;  %v474_v61 = vld [vmem:[#allocation5 + $0x30] sm:$0xff]  ;;  %v475_v62 = vld [vmem:[#allocation5 + $0x38] sm:$0xff]  ;;  %v476_v0 = vld [vmem:[#allocation5 + $0x40] sm:$0xff] }
  0x30   :  { %644 = vmatprep.subr.bf16.mxu0 %v746_v9  ;;  %632 = vmatprep.subr.bf16.mxu1 %v751_v11  ;;  %v709_v63 = vpack.c.bf16 %v475_v62, %v474_v61  ;;  %v477_v1 = vld [vmem:[#allocation5 + $0x48] sm:$0xff]  ;;  %v478_v3 = vld [vmem:[#allocation5 + $0x50] sm:$0xff]  ;;  %v479_v4 = vld [vmem:[#allocation5 + $0x58] sm:$0xff] }
  0x31   :  { %86 = vperm.xlu0 %742, %v51_v7   ;;  %v712_v2 = vpack.c.bf16 %v477_v1, %v476_v0  ;;  %v715_v5 = vpack.c.bf16 %v479_v4, %v478_v3  ;;  %v480_v6 = vld [vmem:[#allocation5 + $0x60] sm:$0xff]  ;;  %v481_v7 = vld [vmem:[#allocation5 + $0x68] sm:$0xff]  ;;  %v483_v10 = vld [vmem:[#allocation5 + $0x78] sm:$0xff] }
  0x32   :  { %v718_v8 = vpack.c.bf16 %v481_v7, %v480_v6 }
  0x33   :  { %645 = vmatpush3.bf16.msra.mxu0 %v746_v9  ;;  %633 = vmatpush3.bf16.msra.mxu1 %v751_v11  ;;  %v482_v9 = vld [vmem:[#allocation5 + $0x70] sm:$0xff] }
  0x34   :  { %646 = vmatprep.subr.bf16.mxu0 %v748_v12  ;;  %634 = vmatprep.subr.bf16.mxu1 %v753_v13  ;;  %v721_v11 = vpack.c.bf16 %v483_v10, %v482_v9 }
  0x37   :  { %647 = vmatpush3.bf16.msra.mxu0 %v748_v12  ;;  %635 = vmatpush3.bf16.msra.mxu1 %v753_v13  ;;  %v380_v12 = vshrl.u32 %v53_v15, 7 }
  0x38   :  { %652 = vmatprep.subr.bf16.mxu0 %v750_v14  ;;  %699 = vmatprep.subr.bf16.mxu1 %v836_v54 }
  0x39   :  { %v486_v13 = vsub.s32 1, %v380_v12 }
  0xa8   :  { %v63_v17 = vpop.permute.xlu1 %62  ;;  %v57_v18 = vpop.permute.xlu0 %56 }
  0xa9   :  { %vm69_vm0 = vcmp.eq.s32.totalorder %v54_v16, %v63_v17  ;;  %vm67_vm1 = vcmp.eq.s32.totalorder %v54_v16, %v57_v18 }
  0xaa   :  { %v73_v22 = vsel %vm69_vm0, 1.0, %v835_v21  ;;  %v71_v23 = vsel %vm67_vm1, 1.0, %v835_v21 }
  0xac   :  { %v66_v19 = vpop.permute.xlu1 %65  ;;  %v60_v20 = vpop.permute.xlu0 %59 }
  0xad   :  { %vm70_vm2 = vcmp.eq.s32.totalorder %v54_v16, %v66_v19  ;;  %vm68_vm3 = vcmp.eq.s32.totalorder %v54_v16, %v60_v20 }
  0xae   :  { %v74_v24 = vsel %vm70_vm2, 1.0, %v835_v21  ;;  %v72_v25 = vsel %vm68_vm3, 1.0, %v835_v21 }
  0xaf   :  { %v76_v26 = vpack.c.bf16 %v74_v24, %v73_v22  ;;  %v75_v27 = vpack.c.bf16 %v72_v25, %v71_v23  ;;  %v381_v22 = vsub.s32 0, %v380_v12  ;;  %v395_v23 = vadd.s32 24, %v380_v12 }
  0xb0   :  { %v87_v28 = vpop.permute.xlu0 %86 }
  0xb1   :  { %vm88_vm6 = vcmp.eq.s32.totalorder %v54_v16, %v87_v28  ;;  %648 = vmatprep.mubr.msk.bf16.mxu0 %vm145_vm4, %v75_v27  ;;  %v291_v30 = vrot.slane %v75_v27, 1  ;;  %v292_v31 = vrot.slane %v76_v26, 1  ;;  %v104_v33 = vshll.u32 %v75_v27, 16 }
  0xb2   :  { %v89_v32 = vsel %vm88_vm6, 1.0, %v835_v21  ;;  %649 = vmatmul.mubr.msk.bf16.vlgmr.msra.gmra.mrb[0].mxu0 %vm145_vm4, %v76_v26  ;;  %v109_v34 = vshll.u32 %v76_v26, 16  ;;  %v102_v37 = vshrl.u32 %v75_v27, 16  ;;  %v113_v42 = vshrl.u32 %v76_v26, 16 }
  0xb3   :  { %v90_v35 = vpack.c.bf16 %v89_v32, %v89_v32  ;;  %653 = vmatpush3.bf16.msra.mxu0 %v750_v14  ;;  %v293_v36 = vsel %vm290_vm5, %v291_v30, %v292_v31  ;;  %v106_v38 = vrot.slane %v104_v33, 1  ;;  %v52_v14 = vld [vmem:[%s937_s3] sm:$0x3]  ;;  %v421_v15 = vand.u32 15, %v395_v23  ;;  %s838_s3 = smov [#allocation7]  }
  0xb4   :  { %660 = vmatprep.mubr.msk.bf16.mxu0 %vm145_vm4, %v293_v36  ;;  %654 = vmatprep.subr.bf16.mxu0 %v752_v29  ;;  %v111_v39 = vrot.slane %v109_v34, 1  ;;  %v487_v16 = vrot.slane %v52_v14, %v486_v13  ;;  %v382_v24 = vrot.slane %v52_v14, %v381_v22  ;;  %s565_s26 = sshll.u32 %s838_s3, 4  ;;  %s566_s26 = int_to_ptr.vmem [resolvable:$true] %s565_s26 }
  0xb5   :  { %v117_v41 = vshll.u32 %v90_v35, 16  ;;  %v107_v43 = vor.u32 %v106_v38, %v102_v37  ;;  %v294_v49 = vrot.slane %v90_v35, 1  ;;  %vm447_vm9 = vcmp.lt.s32.totalorder %v421_v15, 14  ;;  %s800_s27 = scalar_lea.vmem %s566_s26, 32  ;;  %p805_p3 = scmp.lt.s32.totalorder %s566_s26, %s566_s26 }
  0xb6   :  { %v115_v45 = vor.u32 %v113_v42, %v111_v39  ;;  %p801_p2 = scmp.ne.s32.totalorder %s566_s26, %s800_s27  ;;  %p806_p4 = scmp.lt.s32.totalorder %s800_s27, %s800_s27 }
  0xb7   :  { %v119_v44 = vrot.slane %v117_v41, 1  ;;  %655 = vmatpush3.bf16.msra.mxu0 %v752_v29  ;;  %v112_v46 = vsel %vm100_vm7, %v107_v43, %v111_v39  ;;  %v295_v50 = vsel %vm290_vm5, %v292_v31, %v294_v49 }
  0xb8   :  { %656 = vmatprep.subr.bf16.mxu0 %v754_v40  ;;  %636 = vmatprep.mubr.msk.bf16.mxu1 %vm145_vm4, %v112_v46  ;;  %p807_p5 = por %p806_p4, %p805_p3 }
  0xb9   :  { %v120_v48 = vsel %vm100_vm7, %v115_v45, %v119_v44 }
  0xba   :  { %637 = vmatmul.mubr.msk.bf16.vlgmr.msra.gmra.mrb[0].mxu1 %vm145_vm4, %v120_v48  ;;  %p808_p6 = pnand %p807_p5, %p801_p2 }
  0xbb   :  { %657 = vmatpush3.bf16.msra.mxu0 %v754_v40  ;;  %701 = vmatpush3.bf16.msra.mxu1 %v700_v53 }
  0xbc   :  { %658 = vmatprep.subr.bf16.mxu0 %v755_v47  ;;  %702 = vmatprep.subr.bf16.mxu1 %v836_v54 }
  0xbd   :  { %696 = vmatprep.mubr.msk.f32.mxu1 %vm837_vm8, %v835_v21  ;;  %v393_v21 = vadd.s32 8, %v380_v12 }
  0xbf   :  { %659 = vmatpush3.bf16.msra.mxu0 %v755_v47  ;;  %704 = vmatpush3.bf16.msra.mxu1 %v703_v57  ;;  %v407_v33 = vand.u32 15, %v393_v21 }
  0xc0   :  { %705 = vmatprep.subr.bf16.mxu1 %v836_v54 }
  0xc1   :  { %vm445_vm10 = vcmp.lt.s32.totalorder %v407_v33, 14 }
  0xc2   :  { %661 = vmatmul.mubr.msk.bf16.vlgmr.msra.gmra.mrb[0].mxu0 %vm145_vm4, %v295_v50 }
  0xc3   :  { %707 = vmatpush3.bf16.msra.mxu1 %v706_v60 }
  0xc4   :  { %708 = vmatprep.subr.bf16.mxu1 %v836_v54 }
  0xc7   :  { %710 = vmatpush3.bf16.msra.mxu1 %v709_v63 }
  0xc8   :  { %711 = vmatprep.subr.bf16.mxu1 %v836_v54 }
  0xcb   :  { %713 = vmatpush3.bf16.msra.mxu1 %v712_v2 }
  0xcc   :  { %714 = vmatprep.subr.bf16.mxu1 %v836_v54 }
  0xcf   :  { %716 = vmatpush3.bf16.msra.mxu1 %v715_v5 }
  0xd0   :  { %717 = vmatprep.subr.bf16.mxu1 %v836_v54 }
  0xd3   :  { %719 = vmatpush3.bf16.msra.mxu1 %v718_v8 }
  0xd4   :  { %720 = vmatprep.subr.bf16.mxu1 %v836_v54 }
  0xd7   :  { %722 = vmatpush3.bf16.msra.mxu1 %v721_v11 }
 0x18d   :  { %v638_v17 = vpop.f32.mrb[0].mxu1 }
 0x18e   :  { %v186_v18 = vpop.f32.mrb[1].mxu1 }
 0x18f   :  { %v639_v19 = vpop.f32.mrb[2].mxu1 }
 0x190   :  { %v189_v20 = vpop.f32.mrb[3].mxu1 }
 0x195   :  { %v662_v25 = vpop.f32.mrb[0].mxu0 }
 0x196   :  { %v723_v26 = vadd.f32 %v662_v25, %v638_v17  ;;  %v360_v27 = vpop.f32.mrb[1].mxu0 }
 0x197   :  { %v724_v28 = vadd.f32 %v360_v27, %v186_v18  ;;  %v663_v29 = vpop.f32.mrb[2].mxu0 }
 0x198   :  { %v385_v30 = vadd.f32 %v723_v26, %v382_v24  ;;  %v725_v31 = vadd.f32 %v663_v29, %v639_v19  ;;  %v363_v32 = vpop.f32.mrb[3].mxu0 }
 0x199   :  { %v383_v34 = vadd.f32 %v724_v28, %v382_v24  ;;  %v726_v35 = vadd.f32 %v363_v32, %v189_v20 }
 0x19a   :  { %v386_v36 = vadd.f32 %v725_v31, %v382_v24  ;;  %v389_v39 = vmax.f32 %v385_v30, 0.0 }
 0x19b   :  { %v384_v37 = vadd.f32 %v726_v35, %v382_v24  ;;  %v387_v41 = vmax.f32 %v383_v34, 0.0 }
 0x19c   :  { %v390_v38 = vmax.f32 %v386_v36, 0.0 }
 0x19d   :  { %v388_v40 = vmax.f32 %v384_v37, 0.0 }
 0x19e   :  { %v451_v42 = vsel %vm447_vm9, %v390_v38, 0.0 }
 0x19f   :  { %v459_v43 = vmax.f32 %v389_v39, %v451_v42  ;;  %v449_v44 = vsel %vm445_vm10, %v388_v40, 0.0 }
 0x1a0   :  { %v452_v45 = vmax.f32 %v387_v41, %v449_v44 }
 0x1a1   :  { %v460_v46 = vrot.slane %v459_v43, 4 }
 0x1a2   :  { %v453_v47 = vrot.slane %v452_v45, 4 }
 0x1a3   :  { %v461_v48 = vmax.f32 %v459_v43, %v460_v46 }
 0x1a4   :  { %v454_v49 = vmax.f32 %v452_v45, %v453_v47 }
 0x1a5   :  { %v462_v50 = vrot.slane %v461_v48, 2 }
 0x1a6   :  { %v455_v51 = vrot.slane %v454_v49, 2 }
 0x1a7   :  { %v463_v52 = vmax.f32 %v461_v48, %v462_v50 }
 0x1a8   :  { %v456_v53 = vmax.f32 %v454_v49, %v455_v51 }
 0x1a9   :  { %v464_v54 = vrot.slane %v463_v52, 1 }
 0x1aa   :  { %v457_v55 = vrot.slane %v456_v53, 1 }
 0x1ab   :  { %v465_v56 = vmax.f32 %v463_v52, %v464_v54 }
 0x1ac   :  { %v458_v57 = vmax.f32 %v456_v53, %v457_v55 }
 0x1ae   :  { %v467_v58 = vsel %vm466_vm11, %v458_v57, %v465_v56 }
 0x1af   :  { %697 = vmatmul.mubr.f32.vlgmr.msra.gmra.mrb[4].mxu1 %v467_v58 }
 0x282   :  { %v554_v59 = vpop.f32.mrb[4].mxu1 }
 0x283   :  { %v555_v60 = vadd.f32 %v554_v59, %v487_v16  ;;  %v698_v61 = vpop.f32.mrb[5].mxu1 }
 0x285   :  { %558 = vst [vmem:[#allocation7] sm:$0x3] %v555_v60 }
 0x286   :  { %811 = shalt.err (!%p808_p6)
}
 0x287   :  { %s812_s30 = scalar_lea.hbm %s938_s4, 32 }
 0x288   :  { %p813_p7 = scmp.ne.s32.totalorder %s938_s4, %s812_s30  ;;  %p816_p8 = scmp.lt.u32.totalorder %s812_s30, %s938_s4 }
 0x28a   :  { %p818_p9 = pnand %p816_p8, %p813_p7 }
 0x28c   :  { %821 = shalt.err (!%p818_p9)
}
 0x28d   :  { %568 = dma.vmem_to_hbm [thread:$0]  %s566_s26, 32, %s938_s4, [#allocation4]  }
 0x28e   :  { %826 = dma.done.wait [#allocation4], 32  }
 0x28f   :  { %827 = vsyncadd [#allocation4], 4294967264 }
 0x290   :  { %572 = vsyncpa [#allocation3], 1 }
 0x291   :  { %573 = vsyncpa [#allocation6], 1 }
 0x292   :  { %574 = vsyncpa [#allocation4], 1 }

</bundles_post_ra>
